<compile_context>
chip_gen: v7x
topology: tpu7x:2x2x1
jax: 0.10.0
libtpu: 0.0.40
codegen_flags: <defaults>
</compile_context>

<pallas_src>
import math

import jax
import jax.numpy as jnp
from jax.experimental import pallas as pl
from jax.experimental.pallas import tpu as pltpu


def _round_up(x: int, m: int) -> int:
    return ((x + m - 1) // m) * m


def _cdiv(a: int, b: int) -> int:
    return -(-a // b)


def _pick_group_factor(E: int, H: int, cap: int = 16) -> int:
    """Frames packed per row so loads (G*E) and stores (G*H) are lane-dense."""
    gE = 128 // math.gcd(E, 128)
    gH = 128 // math.gcd(H, 128)
    G = gE * gH // math.gcd(gE, gH)          # lcm(gE, gH)
    if G > cap:
        # Prioritise dense stores (the biggest single lever observed); loads
        # can stay masked — load/VPU slots are far from saturated here.
        G = gH if gH <= cap else 1
    return max(G, 1)


def _pick_row_tile(n_rows: int, target: int) -> int:
    """Tile size (in grouped rows) for the flattened frame axis.

    * multiple of 8 (sublane tiling)
    * ~`target` rows per grid step (large tiles amortize per-step overhead)
    * even number of grid steps when there is more than one step, so the two
      v7x TensorCores get balanced work under "parallel" semantics.
    """
    unit = 8
    n_pad = _round_up(max(n_rows, 1), unit)
    if n_pad <= max(_round_up(target, unit), unit):
        return n_pad                          # single grid step
    steps = _cdiv(n_pad, _round_up(target, unit))
    if steps % 2:
        steps += 1
    return max(unit, _round_up(_cdiv(n_pad, steps), unit))


# ----------------------------- Pallas kernel ------------------------------ #
def _cascade_kernel(emb_ref, w1_ref, b1_ref, scale_ref, shift_ref,
                    w2_ref, b2_ref, out_ref):
    """One grid step = one tile of grouped frames (G frames per row).

    emb_ref   : (tile, G*E)   grouped embedded text rows (bf16/f32)
    w1_ref    : (G*E, G*M)    block-diagonal text_to_feat projection
    b1_ref    : (1, G*M)
    scale_ref : (1, G*M)      transform_middle affine
    shift_ref : (1, G*M)
    w2_ref    : (G*M, G*H)    block-diagonal feat_to_wave projection
    b2_ref    : (1, G*H)
    out_ref   : (tile, G*H)   lane-dense waveform tile (stored directly)
    """
    # text_to_feat: linear + tanh (f32 accumulation on the MXU)
    feat = jnp.dot(emb_ref[...], w1_ref[...],
                   preferred_element_type=jnp.float32)
    feat = jnp.tanh(feat + b1_ref[...])

    # transform_middle: per-channel affine + ReLU (f32, VPU)
    feat = jnp.maximum(feat * scale_ref[...] + shift_ref[...], 0.0)

    # feat_to_wave: linear + tanh -> lane-dense waveform tile, no relayout
    wave = jnp.dot(feat.astype(w2_ref.dtype), w2_ref[...],
                   preferred_element_type=jnp.float32)
    out_ref[...] = jnp.tanh(wave + b2_ref[...]).astype(out_ref.dtype)


# ------------------------------- wrapper ----------------------------------- #
def cascade_text_to_wave(text, params, max_length=None, *, use_bf16=True,
                         row_target_frames=1024):
    """text: (B, S) int32 token ids -> waveform (B, 1, T*HOP) float32."""
    compute_dtype = jnp.bfloat16 if use_bf16 else jnp.float32

    emb_tab = params["emb"]            # (V, E)
    w1, b1 = params["w1"], params["b1"]
    scale, shift = params["scale"], params["shift"]
    w2, b2 = params["w2"], params["b2"]

    E = emb_tab.shape[1]
    M = w1.shape[1]
    H = w2.shape[1]
    G = _pick_group_factor(E, H)       # frames packed per kernel row

    # Block-diagonal weights so G frames share one matmul row.  Exact: each
    # frame's channels only ever multiply its own diagonal block; biases /
    # affine are tiled per-frame.  (Weights stay tiny: <256 KiB even padded.)
    eye_g = jnp.eye(G, dtype=jnp.float32)
    w1_bd = jnp.kron(eye_g, w1).astype(compute_dtype)        # (G*E, G*M)
    w2_bd = jnp.kron(eye_g, w2).astype(compute_dtype)        # (G*M, G*H)
    b1_t = jnp.tile(b1, (1, G)).astype(jnp.float32)          # (1, G*M)
    scale_t = jnp.tile(scale, (1, G)).astype(jnp.float32)
    shift_t = jnp.tile(shift, (1, G)).astype(jnp.float32)
    b2_t = jnp.tile(b2, (1, G)).astype(jnp.float32)          # (1, G*H)

    # glue: un-padded bf16 embedding gather + max_length truncation / padding.
    # TODO(synk): fuse this gather into the kernel via scalar-prefetched ids
    # and a VMEM-resident table to remove the (R, E) HBM round trip.
    emb = emb_tab.astype(compute_dtype)[text]                 # (B, S, E)
    if max_length is not None:
        S = emb.shape[1]
        if max_length <= S:
            emb = emb[:, :max_length]
        else:
            emb = jnp.pad(emb, ((0, 0), (0, max_length - S), (0, 0)))
    B, T, _ = emb.shape

    # Flatten batch*time frames, then pack G frames per row (free row-major
    # reshape of contiguous bytes, done outside the kernel).
    R = B * T
    Rg = _cdiv(R, G)
    emb_flat = emb.reshape(R, E)
    if Rg * G != R:
        emb_flat = jnp.pad(emb_flat, ((0, Rg * G - R), (0, 0)))
    emb_groups = emb_flat.reshape(Rg, G * E)

    target_groups = max(8, row_target_frames // G)
    tile = _pick_row_tile(Rg, target_groups)
    Rg_pad = _round_up(Rg, tile)
    if Rg_pad != Rg:
        emb_groups = jnp.pad(emb_groups, ((0, Rg_pad - Rg), (0, 0)))
    num_tiles = Rg_pad // tile

    cost = pl.CostEstimate(
        flops=2 * Rg_pad * ((G * E) * (G * M) + (G * M) * (G * H)),
        transcendentals=Rg_pad * (G * M + G * H),
        bytes_accessed=(emb_groups.size * emb_groups.dtype.itemsize
                        + Rg_pad * G * H * 4
                        + (w1_bd.size + w2_bd.size) * w1_bd.dtype.itemsize
                        + (b1_t.size + scale_t.size + shift_t.size
                           + b2_t.size) * 4),
    )

    out = pl.pallas_call(
        _cascade_kernel,
        out_shape=jax.ShapeDtypeStruct((Rg_pad, G * H), jnp.float32),
        grid_spec=pltpu.PrefetchScalarGridSpec(
            num_scalar_prefetch=0,
            grid=(num_tiles,),
            in_specs=[
                pl.BlockSpec((tile, G * E), lambda i: (i, 0)),
                # loop-invariant weights / biases: constant index_map -> the
                # block is DMA'd once and reused across grid steps.
                pl.BlockSpec((G * E, G * M), lambda i: (0, 0)),
                pl.BlockSpec((1, G * M), lambda i: (0, 0)),
                pl.BlockSpec((1, G * M), lambda i: (0, 0)),
                pl.BlockSpec((1, G * M), lambda i: (0, 0)),
                pl.BlockSpec((G * M, G * H), lambda i: (0, 0)),
                pl.BlockSpec((1, G * H), lambda i: (0, 0)),
            ],
            out_specs=pl.BlockSpec((tile, G * H), lambda i: (i, 0)),
        ),
        compiler_params=pltpu.CompilerParams(
            dimension_semantics=("parallel",),
            vmem_limit_bytes=32 * 1024 * 1024,
        ),
        cost_estimate=cost,
    )(emb_groups, w1_bd, b1_t, scale_t, shift_t, w2_bd, b2_t)

    # (Rg_pad, G*H) is the row-major flattening of (Rg_pad*G, H) frames; strip
    # padding frames and present PyTorch-style (B, 1, T*HOP).
    # TODO(synk): if downstream tolerates bf16 audio, emit bf16 from the kernel
    # to halve the dominant output write stream.
    return out.reshape(Rg_pad * G, H)[:R].reshape(B, 1, T * H)


def cascade_reference(text, params, max_length=None):
    """Pure-JAX f32 reference matching the cascade semantics."""
    emb = params["emb"][text]
    if max_length is not None:
        S = emb.shape[1]
        if max_length <= S:
            emb = emb[:, :max_length]
        else:
            emb = jnp.pad(emb, ((0, 0), (0, max_length - S), (0, 0)))
    feat = jnp.tanh(emb @ params["w1"] + params["b1"])
    feat = jnp.maximum(feat * params["scale"] + params["shift"], 0.0)
    wave = jnp.tanh(feat @ params["w2"] + params["b2"])
    B, T, H = wave.shape
    return wave.reshape(B, 1, T * H)


# ------------------------------ example run -------------------------------- #
if __name__ == "__main__":
    # small, deterministic shapes
    B, S = 2, 16         # batch, text sequence length
    V, E = 40, 32        # vocab size, embedding dim
    M = 32               # mel / feature channels
    HOP = 64             # waveform samples emitted per frame

    key = jax.random.PRNGKey(0)
    k_emb, k_w1, k_b1, k_sc, k_sh, k_w2, k_b2, k_txt = jax.random.split(key, 8)

    params = {
        "emb":   jax.random.normal(k_emb, (V, E), jnp.float32) * 0.1,
        "w1":    jax.random.normal(k_w1, (E, M), jnp.float32) * 0.1,
        "b1":    jax.random.normal(k_b1, (1, M), jnp.float32) * 0.01,
        "scale": 1.0 + 0.1 * jax.random.normal(k_sc, (1, M), jnp.float32),
        "shift": 0.01 * jax.random.normal(k_sh, (1, M), jnp.float32),
        "w2":    jax.random.normal(k_w2, (M, HOP), jnp.float32) * 0.1,
        "b2":    jax.random.normal(k_b2, (1, HOP), jnp.float32) * 0.01,
    }

    text = jax.random.randint(k_txt, (B, S), 0, V, dtype=jnp.int32)

    # TODO(synk): the PyTorch `inference` path (per-submodule .inference
    # dispatch via unwrap()) is a Python-level dispatch detail with no kernel
    # analogue; forward semantics are what is implemented here.
    wave = cascade_text_to_wave(text, params, max_length=S, use_bf16=True)
    wave = jax.block_until_ready(wave)

    ref = cascade_reference(text, params, max_length=S)
    assert wave.shape == (B, 1, S * HOP), wave.shape
    # bf16 matmul operands / bf16 embedding (f32 accumulation + f32 epilogue)
    # -> loose-but-safe tolerance vs the pure-f32 reference; tanh-bounded
    # outputs keep the absolute error tiny.
    assert jnp.allclose(wave, ref, atol=2e-2, rtol=2e-2), (
        float(jnp.max(jnp.abs(wave - ref)))
    )

    print("KERNEL_OK")
</pallas_src>

<mosaic_0001>
module attributes {stable_mosaic.version = 11 : i64} {
  func.func @_cascade_kernel(%arg0: i32, %arg1: memref<8x128xbf16, #tpu.memory_space<vmem>>, %arg2: memref<128x128xbf16, #tpu.memory_space<vmem>>, %arg3: memref<1x128xf32, #tpu.memory_space<vmem>>, %arg4: memref<1x128xf32, #tpu.memory_space<vmem>>, %arg5: memref<1x128xf32, #tpu.memory_space<vmem>>, %arg6: memref<128x256xbf16, #tpu.memory_space<vmem>>, %arg7: memref<1x256xf32, #tpu.memory_space<vmem>>, %arg8: memref<8x256xf32, #tpu.memory_space<vmem>>) attributes {dimension_semantics = [#tpu.dimension_semantics<parallel>], iteration_bounds = array<i64: 1>, scalar_prefetch = 0 : i64, scratch_operands = 0 : i64, tpu.core_type = #tpu.core_type<tc>, window_params = [{transform_indices = @transform_0, window_bounds = array<i64: 8, 128>}, {pipeline_mode = #tpu.pipeline_mode<synchronous>, transform_indices = @transform_1, window_bounds = array<i64: 128, 128>}, {pipeline_mode = #tpu.pipeline_mode<synchronous>, transform_indices = @transform_2, window_bounds = array<i64: 1, 128>}, {pipeline_mode = #tpu.pipeline_mode<synchronous>, transform_indices = @transform_3, window_bounds = array<i64: 1, 128>}, {pipeline_mode = #tpu.pipeline_mode<synchronous>, transform_indices = @transform_4, window_bounds = array<i64: 1, 128>}, {pipeline_mode = #tpu.pipeline_mode<synchronous>, transform_indices = @transform_5, window_bounds = array<i64: 128, 256>}, {pipeline_mode = #tpu.pipeline_mode<synchronous>, transform_indices = @transform_6, window_bounds = array<i64: 1, 256>}, {transform_indices = @transform_7, window_bounds = array<i64: 8, 256>}]} {
    %c0 = arith.constant 0 : index
    %c0_0 = arith.constant 0 : index
    %0 = vector.load %arg1[%c0, %c0_0] : memref<8x128xbf16, #tpu.memory_space<vmem>>, vector<8x128xbf16>
    %c0_1 = arith.constant 0 : index
    %c0_2 = arith.constant 0 : index
    %1 = vector.load %arg2[%c0_1, %c0_2] : memref<128x128xbf16, #tpu.memory_space<vmem>>, vector<128x128xbf16>
    %cst = arith.constant dense<0.000000e+00> : vector<8x128xf32>
    %2 = tpu.matmul %0, %1, %cst {dimension_numbers = #tpu.dot_dimension_numbers<[1], [0], [0], [1], [0, 0, 1, 1], [], []>} : vector<8x128xbf16>, vector<128x128xbf16>, vector<8x128xf32> -> vector<8x128xf32>
    %c0_3 = arith.constant 0 : index
    %c0_4 = arith.constant 0 : index
    %3 = vector.load %arg3[%c0_3, %c0_4] : memref<1x128xf32, #tpu.memory_space<vmem>>, vector<1x128xf32>
    %4 = vector.broadcast %3 : vector<1x128xf32> to vector<8x128xf32>
    %5 = arith.addf %2, %4 : vector<8x128xf32>
    %6 = math.tanh %5 : vector<8x128xf32>
    %c0_5 = arith.constant 0 : index
    %c0_6 = arith.constant 0 : index
    %7 = vector.load %arg4[%c0_5, %c0_6] : memref<1x128xf32, #tpu.memory_space<vmem>>, vector<1x128xf32>
    %8 = vector.broadcast %7 : vector<1x128xf32> to vector<8x128xf32>
    %9 = arith.mulf %6, %8 : vector<8x128xf32>
    %c0_7 = arith.constant 0 : index
    %c0_8 = arith.constant 0 : index
    %10 = vector.load %arg5[%c0_7, %c0_8] : memref<1x128xf32, #tpu.memory_space<vmem>>, vector<1x128xf32>
    %11 = vector.broadcast %10 : vector<1x128xf32> to vector<8x128xf32>
    %12 = arith.addf %9, %11 : vector<8x128xf32>
    %cst_9 = arith.constant 0.000000e+00 : f32
    %13 = vector.broadcast %cst_9 : f32 to vector<8x128xf32>
    %14 = arith.maximumf %12, %13 : vector<8x128xf32>
    %15 = arith.truncf %14 : vector<8x128xf32> to vector<8x128xbf16>
    %c0_10 = arith.constant 0 : index
    %c0_11 = arith.constant 0 : index
    %16 = vector.load %arg6[%c0_10, %c0_11] : memref<128x256xbf16, #tpu.memory_space<vmem>>, vector<128x256xbf16>
    %cst_12 = arith.constant dense<0.000000e+00> : vector<8x256xf32>
    %17 = tpu.matmul %15, %16, %cst_12 {dimension_numbers = #tpu.dot_dimension_numbers<[1], [0], [0], [1], [0, 0, 1, 1], [], []>} : vector<8x128xbf16>, vector<128x256xbf16>, vector<8x256xf32> -> vector<8x256xf32>
    %c0_13 = arith.constant 0 : index
    %c0_14 = arith.constant 0 : index
    %18 = vector.load %arg7[%c0_13, %c0_14] : memref<1x256xf32, #tpu.memory_space<vmem>>, vector<1x256xf32>
    %19 = vector.broadcast %18 : vector<1x256xf32> to vector<8x256xf32>
    %20 = arith.addf %17, %19 : vector<8x256xf32>
    %21 = math.tanh %20 : vector<8x256xf32>
    %c0_15 = arith.constant 0 : index
    %c0_16 = arith.constant 0 : index
    %22 = vector.load %arg8[%c0_15, %c0_16] : memref<8x256xf32, #tpu.memory_space<vmem>>, vector<8x256xf32>
    tpu.vector_store %arg8[%c0_15, %c0_16], %21 {strides = array<i32>} : memref<8x256xf32, #tpu.memory_space<vmem>>, vector<8x256xf32>,
    return
  }
  func.func @transform_0(%arg0: i32) -> (i32, i32) {
    %c0_i32 = arith.constant 0 : i32
    %c0_i32_0 = arith.constant 0 : i32
    return %arg0, %c0_i32 : i32, i32
  }
  func.func @transform_1(%arg0: i32) -> (i32, i32) {
    %c0_i32 = arith.constant 0 : i32
    %c0_i32_0 = arith.constant 0 : i32
    %c0_i32_1 = arith.constant 0 : i32
    return %c0_i32, %c0_i32_0 : i32, i32
  }
  func.func @transform_2(%arg0: i32) -> (i32, i32) {
    %c0_i32 = arith.constant 0 : i32
    %c0_i32_0 = arith.constant 0 : i32
    %c0_i32_1 = arith.constant 0 : i32
    return %c0_i32, %c0_i32_0 : i32, i32
  }
  func.func @transform_3(%arg0: i32) -> (i32, i32) {
    %c0_i32 = arith.constant 0 : i32
    %c0_i32_0 = arith.constant 0 : i32
    %c0_i32_1 = arith.constant 0 : i32
    return %c0_i32, %c0_i32_0 : i32, i32
  }
  func.func @transform_4(%arg0: i32) -> (i32, i32) {
    %c0_i32 = arith.constant 0 : i32
    %c0_i32_0 = arith.constant 0 : i32
    %c0_i32_1 = arith.constant 0 : i32
    return %c0_i32, %c0_i32_0 : i32, i32
  }
  func.func @transform_5(%arg0: i32) -> (i32, i32) {
    %c0_i32 = arith.constant 0 : i32
    %c0_i32_0 = arith.constant 0 : i32
    %c0_i32_1 = arith.constant 0 : i32
    return %c0_i32, %c0_i32_0 : i32, i32
  }
  func.func @transform_6(%arg0: i32) -> (i32, i32) {
    %c0_i32 = arith.constant 0 : i32
    %c0_i32_0 = arith.constant 0 : i32
    %c0_i32_1 = arith.constant 0 : i32
    return %c0_i32, %c0_i32_0 : i32, i32
  }
  func.func @transform_7(%arg0: i32) -> (i32, i32) {
    %c0_i32 = arith.constant 0 : i32
    %c0_i32_0 = arith.constant 0 : i32
    return %arg0, %c0_i32 : i32, i32
  }
}

</mosaic_0001>

<bundles_post_ra>
// kernel: tpu_custom_call.1
= control target key start
LH: loop header
LB: loop body
LE: loop exit
PB: predicated region body
PF: predicated region fallthrough
CT: control target
= control target key end

     0   :  { %12 = vsyncpa [#allocation3], 0  ;;  %s677_s0 = inlined_call_operand.hbm [shape: bf16[8,128], index: 0, kind: input, shape index: {}]   ;;  %s678_s1 = inlined_call_operand.hbm [shape: bf16[128,128], index: 1, kind: input, shape index: {}]   ;;  %s679_s2 = inlined_call_operand.vmem [shape: f32[1,128], index: 2, kind: input, shape index: {}]   ;;  %s680_s3 = inlined_call_operand.vmem [shape: f32[1,128], index: 3, kind: input, shape index: {}]   ;;  %s681_s4 = inlined_call_operand.vmem [shape: f32[1,128], index: 4, kind: input, shape index: {}]   ;;  %s682_s5 = inlined_call_operand.hbm [shape: bf16[128,256], index: 5, kind: input, shape index: {}]   ;;  %s683_s6 = inlined_call_operand.vmem [shape: f32[1,256], index: 6, kind: input, shape index: {}]   ;;  %s684_s7 = inlined_call_operand.hbm [shape: f32[8,256], index: 7, kind: output, shape index: {}]  }
   0x1   :  { %13 = vsyncpa [#allocation6], 0 }
   0x2   :  { %14 = vsyncpa [#allocation4], 0  ;;  %s566_s24 = smov [#allocation5]   ;;  %s472_s28 = scalar_lea.hbm %s678_s1, 1024 }
   0x3   :  { %s30_s25 = sshll.u32 %s566_s24, 4  ;;  %p473_p0 = scmp.ne.s32.totalorder %s678_s1, %s472_s28  ;;  %s31_s25 = int_to_ptr.vmem [resolvable:$true] %s30_s25 }
   0x4   :  { %p476_p1 = scmp.lt.u32.totalorder %s472_s28, %s678_s1 }
   0x6   :  { %p478_p2 = pnand %p476_p1, %p473_p0 }
   0x8   :  { %481 = shalt.err (!%p478_p2)
}
   0x9   :  { %s482_s10 = scalar_lea.vmem %s31_s25, 1024  ;;  %p487_p4 = scmp.lt.s32.totalorder %s31_s25, %s31_s25 }
   0xa   :  { %p483_p3 = scmp.ne.s32.totalorder %s31_s25, %s482_s10  ;;  %p488_p5 = scmp.lt.s32.totalorder %s482_s10, %s482_s10 }
   0xc   :  { %p489_p6 = por %p488_p5, %p487_p4 }
   0xe   :  { %p490_p7 = pnand %p489_p6, %p483_p3 }
  0x10   :  { %493 = shalt.err (!%p490_p7)
}
  0x11   :  { %s567_s11 = smov 64   ;;  %s568_s12 = smov 4  }
  0x12   :  { %36 = dma.hbm_to_vmem [thread:$0]  %s678_s1, 1024, %s31_s25, [#allocation6], %s567_s11, %s567_s11, %s568_s12  }
  0x13   :  { %s569_s15 = smov [#allocation2]   ;;  %s570_s17 = smov [#allocation7]  }
  0x14   :  { %s21_s16 = sshll.u32 %s569_s15, 4  ;;  %s48_s18 = sshll.u32 %s570_s17, 4  ;;  %s22_s16 = int_to_ptr.vmem [resolvable:$true] %s21_s16  ;;  %s49_s18 = int_to_ptr.vmem [resolvable:$true] %s48_s18 }
  0x15   :  { %s494_s21 = scalar_lea.hbm %s677_s0, 64 }
  0x16   :  { %p495_p8 = scmp.ne.s32.totalorder %s677_s0, %s494_s21  ;;  %p498_p9 = scmp.lt.u32.totalorder %s494_s21, %s677_s0 }
  0x18   :  { %p500_p10 = pnand %p498_p9, %p495_p8 }
  0x1a   :  { %503 = shalt.err (!%p500_p10)
}
  0x1b   :  { %s504_s1 = scalar_lea.vmem %s22_s16, 64  ;;  %p509_p12 = scmp.lt.s32.totalorder %s22_s16, %s22_s16 }
  0x1c   :  { %p505_p11 = scmp.ne.s32.totalorder %s22_s16, %s504_s1  ;;  %p510_p13 = scmp.lt.s32.totalorder %s504_s1, %s504_s1 }
  0x1e   :  { %p511_p0 = por %p510_p13, %p509_p12 }
  0x20   :  { %p512_p1 = pnand %p511_p0, %p505_p11 }
  0x22   :  { %515 = shalt.err (!%p512_p1)
}
  0x23   :  { %24 = dma.hbm_to_vmem [thread:$0]  %s677_s0, 64, %s22_s16, [#allocation3]  }
  0x24   :  { %s516_s30 = scalar_lea.hbm %s682_s5, 2048 }
  0x25   :  { %p517_p2 = scmp.ne.s32.totalorder %s682_s5, %s516_s30  ;;  %p520_p3 = scmp.lt.u32.totalorder %s516_s30, %s682_s5 }
  0x27   :  { %p522_p4 = pnand %p520_p3, %p517_p2 }
  0x29   :  { %525 = shalt.err (!%p522_p4)
}
  0x2a   :  { %s526_s12 = scalar_lea.vmem %s49_s18, 2048  ;;  %p531_p6 = scmp.lt.s32.totalorder %s49_s18, %s49_s18 }
  0x2b   :  { %p527_p5 = scmp.ne.s32.totalorder %s49_s18, %s526_s12  ;;  %p532_p7 = scmp.lt.s32.totalorder %s526_s12, %s526_s12 }
  0x2d   :  { %p533_p8 = por %p532_p7, %p531_p6 }
  0x2f   :  { %p534_p9 = pnand %p533_p8, %p527_p5 }
  0x31   :  { %537 = shalt.err (!%p534_p9)
}
  0x32   :  { %s571_s0 = smov 128   ;;  %s572_s13 = smov 8  }
  0x33   :  { %54 = dma.hbm_to_vmem [thread:$0]  %s682_s5, 2048, %s49_s18, [#allocation6], %s571_s0, %s571_s0, %s572_s13  }
  0x34   :  { %560 = dma.done.wait [#allocation3], 64  }
  0x35   :  { %561 = vsyncadd [#allocation3], 4294967232 }
  0x36   :  { %562 = dma.done.wait [#allocation6], 3072  }
  0x37   :  { %563 = vsyncadd [#allocation6], 4294964224  ;;  %v573_v0 = vmov 0.0   ;;  %vm574_vm0 = vmmov 0   ;;  %v434_v1 = vld [vmem:[#allocation5] sm:$0xff]   ;;  %v435_v2 = vld [vmem:[#allocation5 + $0x8] sm:$0xff]   ;;  %v216_v40 = vlaneseq }
  0x38   :  { %403 = vmatprep.subr.bf16.mxu0 %v573_v0  ;;  %419 = vmatprep.mubr.msk.bf16.mxu0 %vm574_vm0, %v573_v0  ;;  %v436_v3 = vld [vmem:[#allocation5 + $0x10] sm:$0xff]   ;;  %v442_v4 = vld [vmem:[#allocation7 + $0x4] ss:$8 sps:$4 sm:$0xff]   ;;  %v444_v5 = vld [vmem:[#allocation7] ss:$8 sps:$4 sm:$0xff]   ;;  %v575_v21 = vmov 0  }
  0x39   :  { %404 = vmatpush3.bf16.msra.mxu0 %v434_v1  ;;  %v437_v6 = vld [vmem:[#allocation5 + $0x18] sm:$0xff]   ;;  %306 = vmatprep.subr.bf16.mxu1 %v442_v4  ;;  %v438_v8 = vld [vmem:[#allocation5 + $0x20] sm:$0xff]   ;;  %v439_v12 = vld [vmem:[#allocation5 + $0x28] sm:$0xff]   ;;  %v217_v41 = vshrl.u32 %v216_v40, 7 }
  0x3a   :  { %405 = vmatprep.subr.bf16.mxu0 %v573_v0  ;;  %v445_v7 = vld [vmem:[#allocation7 + $0x14] ss:$8 sps:$4 sm:$0xff]   ;;  %307 = vmatpush1.bf16.msra.mxu1 %v444_v5  ;;  %v447_v9 = vld [vmem:[#allocation7 + $0x10] ss:$8 sps:$4 sm:$0xff]   ;;  %v448_v10 = vld [vmem:[#allocation7 + $0x24] ss:$8 sps:$4 sm:$0xff]  }
  0x3b   :  { %308 = vmatprep.subr.bf16.mxu1 %v445_v7  ;;  %v450_v11 = vld [vmem:[#allocation7 + $0x20] ss:$8 sps:$4 sm:$0xff]   ;;  %v440_v13 = vld [vmem:[#allocation5 + $0x30] sm:$0xff]   ;;  %v441_v14 = vld [vmem:[#allocation5 + $0x38] sm:$0xff]   ;;  %338 = vmatprep.mubr.bf16.mxu1 %v575_v21  ;;  %v218_v42 = vsub.s32 0, %v217_v41  ;;  %v222_v44 = vsub.s32 1, %v217_v41 }
  0x3c   :  { %v67_v15 = vld [vmem:[#allocation2] sm:$0xf]  ;;  %v453_v17 = vld [vmem:[#allocation7 + $0x30] ss:$8 sps:$4 sm:$0xff]   ;;  %v454_v18 = vld [vmem:[#allocation7 + $0x44] ss:$8 sps:$4 sm:$0xff]  }
  0x3d   :  { %406 = vmatpush3.bf16.msra.mxu0 %v435_v2  ;;  %v451_v16 = vld [vmem:[#allocation7 + $0x34] ss:$8 sps:$4 sm:$0xff]   ;;  %v456_v19 = vld [vmem:[#allocation7 + $0x40] ss:$8 sps:$4 sm:$0xff]   ;;  %v459_v22 = vld [vmem:[#allocation7 + $0x50] ss:$8 sps:$4 sm:$0xff]  }
  0x3e   :  { %407 = vmatprep.subr.bf16.mxu0 %v573_v0  ;;  %309 = vmatpush1.bf16.msra.mxu1 %v447_v9  ;;  %v457_v20 = vld [vmem:[#allocation7 + $0x54] ss:$8 sps:$4 sm:$0xff]   ;;  %v460_v23 = vld [vmem:[#allocation7 + $0x64] ss:$8 sps:$4 sm:$0xff]   ;;  %v462_v24 = vld [vmem:[#allocation7 + $0x60] ss:$8 sps:$4 sm:$0xff]  }
  0x3f   :  { %310 = vmatprep.subr.bf16.mxu1 %v448_v10  ;;  %v463_v25 = vld [vmem:[#allocation7 + $0x74] ss:$8 sps:$4 sm:$0xff]   ;;  %v465_v26 = vld [vmem:[#allocation7 + $0x70] ss:$8 sps:$4 sm:$0xff]  }
  0x40   :  { %v367_v27 = vld [vmem:[%s679_s2] ss:$0 sm:$0xff] }
  0x41   :  { %408 = vmatpush3.bf16.msra.mxu0 %v436_v3  ;;  %v376_v33 = vld [vmem:[%s680_s3] ss:$0 sm:$0xff]  ;;  %s576_s3 = smov [#allocation8]  }
  0x42   :  { %409 = vmatprep.subr.bf16.mxu0 %v573_v0  ;;  %311 = vmatpush1.bf16.msra.mxu1 %v450_v11  ;;  %v377_v35 = vld [vmem:[%s681_s4] ss:$0 sm:$0xff]  ;;  %s357_s4 = sshll.u32 %s576_s3, 4  ;;  %s358_s4 = int_to_ptr.vmem [resolvable:$true] %s357_s4 }
  0x43   :  { %312 = vmatprep.subr.bf16.mxu1 %v451_v16  ;;  %v214_v43 = vld [vmem:[%s683_s6] sm:$0x3]  ;;  %s538_s22 = scalar_lea.vmem %s358_s4, 256  ;;  %p543_p11 = scmp.lt.s32.totalorder %s358_s4, %s358_s4 }
  0x44   :  { %v219_v45 = vrot.slane %v214_v43, %v218_v42  ;;  %v223_v46 = vrot.slane %v214_v43, %v222_v44  ;;  %p539_p10 = scmp.ne.s32.totalorder %s358_s4, %s538_s22  ;;  %p544_p12 = scmp.lt.s32.totalorder %s538_s22, %s538_s22 }
  0x45   :  { %410 = vmatpush3.bf16.msra.mxu0 %v437_v6 }
  0x46   :  { %411 = vmatprep.subr.bf16.mxu0 %v573_v0  ;;  %313 = vmatpush1.bf16.msra.mxu1 %v453_v17  ;;  %p545_p13 = por %p544_p12, %p543_p11 }
  0x47   :  { %314 = vmatprep.subr.bf16.mxu1 %v454_v18 }
  0x48   :  { %p546_p0 = pnand %p545_p13, %p539_p10 }
  0x49   :  { %412 = vmatpush3.bf16.msra.mxu0 %v438_v8 }
  0x4a   :  { %413 = vmatprep.subr.bf16.mxu0 %v573_v0  ;;  %315 = vmatpush1.bf16.msra.mxu1 %v456_v19 }
  0x4b   :  { %316 = vmatprep.subr.bf16.mxu1 %v457_v20 }
  0x4d   :  { %414 = vmatpush3.bf16.msra.mxu0 %v439_v12 }
  0x4e   :  { %415 = vmatprep.subr.bf16.mxu0 %v573_v0  ;;  %317 = vmatpush1.bf16.msra.mxu1 %v459_v22 }
  0x4f   :  { %318 = vmatprep.subr.bf16.mxu1 %v460_v23 }
  0x51   :  { %416 = vmatpush3.bf16.msra.mxu0 %v440_v13 }
  0x52   :  { %417 = vmatprep.subr.bf16.mxu0 %v573_v0  ;;  %319 = vmatpush1.bf16.msra.mxu1 %v462_v24 }
  0x53   :  { %320 = vmatprep.subr.bf16.mxu1 %v463_v25 }
  0x55   :  { %418 = vmatpush3.bf16.msra.mxu0 %v441_v14 }
  0x56   :  { %321 = vmatpush1.bf16.msra.mxu1 %v465_v26 }
  0x58   :  { %420 = vmatmul.mubr.bf16.vlgmr.msra.gmra.mrb[0].mxu0 %v67_v15 }
 0x12b   :  { %v173_v28 = vpop.f32.mrb[0].mxu0 }
 0x12c   :  { %v174_v29 = vadd.f32 %v367_v27, %v173_v28  ;;  %v421_v30 = vpop.f32.mrb[1].mxu0 }
 0x12d   :  { %v176_v31 = vpop.f32.mrb[2].mxu0 }
 0x12e   :  { %466 = vtanh.f32 %v174_v29  ;;  %v422_v32 = vpop.f32.mrb[3].mxu0 }
 0x138   :  { %v467_v34 = vpop.eup %466 }
 0x139   :  { %v187_v36 = vmul.f32 %v467_v34, %v376_v33 }
 0x13b   :  { %v195_v37 = vadd.f32 %v377_v35, %v187_v36 }
 0x13d   :  { %v196_v38 = vmax.f32 %v195_v37, 0.0 }
 0x13f   :  { %v197_v39 = vpack.c.bf16 %v196_v38, %v196_v38 }
 0x141   :  { %339 = vmatmul.mubr.bf16.vlgmr.msra.gmra.mrb[0].mxu1 %v197_v39 }
 0x214   :  { %v340_v47 = vpop.f32.mrb[0].mxu1 }
 0x215   :  { %v341_v48 = vadd.f32 %v340_v47, %v219_v45  ;;  %v342_v49 = vpop.f32.mrb[1].mxu1 }
 0x216   :  { %v343_v50 = vadd.f32 %v342_v49, %v223_v46  ;;  %v344_v51 = vpop.f32.mrb[2].mxu1 }
 0x217   :  { %468 = vtanh.f32 %v341_v48  ;;  %v345_v52 = vpop.f32.mrb[3].mxu1 }
 0x218   :  { %470 = vtanh.f32 %v343_v50 }
 0x221   :  { %v469_v53 = vpop.eup %468 }
 0x222   :  { %v471_v54 = vpop.eup %470  ;;  %349 = vst [vmem:[#allocation8] sm:$0xff] %v469_v53 }
 0x223   :  { %350 = vst [vmem:[#allocation8 + $0x8] sm:$0xff] %v471_v54 }
 0x224   :  { %549 = shalt.err (!%p546_p0)
}
 0x225   :  { %s550_s24 = scalar_lea.hbm %s684_s7, 256 }
 0x226   :  { %p551_p1 = scmp.ne.s32.totalorder %s684_s7, %s550_s24  ;;  %p554_p2 = scmp.lt.u32.totalorder %s550_s24, %s684_s7 }
 0x228   :  { %p556_p3 = pnand %p554_p2, %p551_p1 }
 0x22a   :  { %559 = shalt.err (!%p556_p3)
}
 0x22b   :  { %360 = dma.vmem_to_hbm [thread:$0]  %s358_s4, 256, %s684_s7, [#allocation4]  }
 0x22c   :  { %564 = dma.done.wait [#allocation4], 256  }
 0x22d   :  { %565 = vsyncadd [#allocation4], 4294967040 }
 0x22e   :  { %364 = vsyncpa [#allocation3], 1 }
 0x22f   :  { %365 = vsyncpa [#allocation6], 1 }
 0x230   :  { %366 = vsyncpa [#allocation4], 1 }

</bundles_post_ra>
